<compile_context>
chip_gen: v7x
topology: tpu7x:2x2x1
jax: 0.10.0
libtpu: 0.0.40
codegen_flags: <defaults>
</compile_context>

<pallas_src>
import jax
import jax.numpy as jnp
from jax.experimental import pallas as pl
from jax.experimental.pallas import tpu as pltpu


def _round_up(x, m):
    return ((x + m - 1) // m) * m


def channel_attention_kernel(x_ref, w1t_ref, w2_ref, o_ref, runmax_ref):
    # x_ref:      (C, THW)     one spatial tile of one batch element
    # w1t_ref:    (C, hidden)  fc1 weight, transposed (w1t[c, j] = w1[j, c])
    # w2_ref:     (C, hidden)  fc2 weight (natural layout)
    # o_ref:      (C, 1)       per-batch attention output
    # runmax_ref: (C, THW)     VMEM running-max accumulator (f32)
    t = pl.program_id(1)

    @pl.when(t == 0)
    def _init():
        runmax_ref[...] = jnp.full_like(runmax_ref, -jnp.inf)

    # Elementwise (VPU) running max across spatial tiles.
    runmax_ref[...] = jnp.maximum(runmax_ref[...], x_ref[...].astype(jnp.float32))

    @pl.when(t == pl.num_programs(1) - 1)
    def _finalize():
        # Single lane-reduce for the adaptive max pool.
        pooled = jnp.max(runmax_ref[...], axis=-1, keepdims=True)        # (C, 1)
        # fc1 (1x1 conv, no bias): h_j = sum_c w1[j, c] * pooled_c
        h = jnp.sum(w1t_ref[...] * pooled, axis=0, keepdims=True)        # (1, hidden)
        h = jnp.maximum(h, 0.0)                                          # ReLU
        # fc2 (1x1 conv, no bias): out_c = sum_j w2[c, j] * h_j
        out = jnp.sum(w2_ref[...] * h, axis=1, keepdims=True)            # (C, 1)
        out = jax.nn.sigmoid(out)
        o_ref[...] = out.astype(o_ref.dtype)


def channel_attention(x, w1, w2, *, tile_budget_bytes=4 * 1024 * 1024):
    """x: (N, C, H, W); w1: (C//16, C, 1, 1); w2: (C, C//16, 1, 1)."""
    N, C, H, W = x.shape
    hidden = w1.shape[0]
    assert w1.shape == (hidden, C, 1, 1) and w2.shape == (C, hidden, 1, 1)
    HW = H * W

    # Lane-dense spatial tile (multiple of 128), sized so that the two
    # double-buffered x tiles plus the running-max scratch stay within a few
    # MiB regardless of image size (safe on v5e 16 MiB / v7x 32 MiB scoped VMEM).
    itemsize = jnp.dtype(x.dtype).itemsize
    cap = max(128, ((tile_budget_bytes // (3 * C * itemsize)) // 128) * 128)
    THW = min(_round_up(HW, 128), cap)
    HW_pad = _round_up(HW, THW)
    num_hw = HW_pad // THW

    x_flat = x.reshape(N, C, HW)
    if HW_pad != HW:
        # Pad the spatial tail with the dtype minimum so it never wins the max.
        fill = jnp.full((N, C, HW_pad - HW), jnp.finfo(x.dtype).min, x.dtype)
        x_flat = jnp.concatenate([x_flat, fill], axis=-1)

    w1t = w1.reshape(hidden, C).T     # (C, hidden)
    w2m = w2.reshape(C, hidden)       # (C, hidden)

    # TODO(synk): if the upstream producer can emit bf16 activations, stream x
    # as bf16 (halves HBM traffic); kept f32 here to match the module dtype.
    out = pl.pallas_call(
        channel_attention_kernel,
        out_shape=jax.ShapeDtypeStruct((N, C, 1), x.dtype),
        grid_spec=pltpu.PrefetchScalarGridSpec(
            num_scalar_prefetch=0,
            grid=(N, num_hw),
            in_specs=[
                pl.BlockSpec((pl.Squeezed(), C, THW), lambda b, t: (b, 0, t)),
                pl.BlockSpec((C, hidden), lambda b, t: (0, 0)),
                pl.BlockSpec((C, hidden), lambda b, t: (0, 0)),
            ],
            out_specs=pl.BlockSpec((pl.Squeezed(), C, 1), lambda b, t: (b, 0, 0)),
            scratch_shapes=[pltpu.VMEM((C, THW), jnp.float32)],
        ),
        compiler_params=pltpu.CompilerParams(
            dimension_semantics=("parallel", "arbitrary"),
            vmem_limit_bytes=32 * 1024 * 1024,
        ),
    )(x_flat, w1t, w2m)

    return out.reshape(N, C, 1, 1)


def reference(x, w1, w2):
    # pure-JAX reference mirroring the PyTorch forward
    pooled = jnp.max(x, axis=(2, 3))                                   # (N, C)
    h = jnp.maximum(pooled @ w1.reshape(w1.shape[0], -1).T, 0.0)       # (N, hidden)
    out = jax.nn.sigmoid(h @ w2.reshape(w2.shape[0], -1).T)            # (N, C)
    return out.reshape(x.shape[0], x.shape[1], 1, 1)


if __name__ == "__main__":
    key = jax.random.PRNGKey(0)
    k_x, k_w1, k_w2 = jax.random.split(key, 3)

    N, C, H, W = 2, 32, 16, 16          # in_planes=32 -> hidden = 32 // 16 = 2
    hidden = C // 16

    x = jax.random.normal(k_x, (N, C, H, W), dtype=jnp.float32)
    # deterministic synthetic weights (Conv2d 1x1, no bias)
    w1 = jax.random.normal(k_w1, (hidden, C, 1, 1), dtype=jnp.float32) * 0.1
    w2 = jax.random.normal(k_w2, (C, hidden, 1, 1), dtype=jnp.float32) * 0.1

    out = jax.block_until_ready(channel_attention(x, w1, w2))
    ref = reference(x, w1, w2)

    assert out.shape == (N, C, 1, 1)
    assert jnp.allclose(out, ref, atol=1e-5, rtol=1e-5)

    print("KERNEL_OK")
</pallas_src>

<mosaic_0001>
module attributes {stable_mosaic.version = 11 : i64} {
  func.func @channel_attention_kernel(%arg0: i32, %arg1: i32, %arg2: memref<1x32x256xf32, #tpu.memory_space<vmem>>, %arg3: memref<32x2xf32, #tpu.memory_space<vmem>>, %arg4: memref<32x2xf32, #tpu.memory_space<vmem>>, %arg5: memref<1x32x1xf32, #tpu.memory_space<vmem>>, %arg6: memref<32x256xf32, #tpu.memory_space<vmem>>) attributes {dimension_semantics = [#tpu.dimension_semantics<parallel>, #tpu.dimension_semantics<arbitrary>], iteration_bounds = array<i64: 2, 1>, scalar_prefetch = 0 : i64, scratch_operands = 1 : i64, tpu.core_type = #tpu.core_type<tc>, window_params = [{transform_indices = @transform_0, window_bounds = array<i64: 1, 32, 256>}, {pipeline_mode = #tpu.pipeline_mode<synchronous>, transform_indices = @transform_1, window_bounds = array<i64: 32, 2>}, {pipeline_mode = #tpu.pipeline_mode<synchronous>, transform_indices = @transform_2, window_bounds = array<i64: 32, 2>}, {transform_indices = @transform_3, window_bounds = array<i64: 1, 32, 1>}]} {
    %c0_i32 = arith.constant 0 : i32
    %0 = arith.cmpi eq, %arg1, %c0_i32 : i32
    %1 = arith.extui %0 : i1 to i32
    %c0_i32_0 = arith.constant 0 : i32
    %2 = arith.cmpi ne, %1, %c0_i32_0 : i32
    scf.if %2 {
      %cst = arith.constant 0xFF800000 : f32
      %11 = vector.broadcast %cst : f32 to vector<32x256xf32>
      %c0_9 = arith.constant 0 : index
      %c0_10 = arith.constant 0 : index
      %12 = vector.load %arg6[%c0_9, %c0_10] : memref<32x256xf32, #tpu.memory_space<vmem>>, vector<32x256xf32>
      tpu.vector_store %arg6[%c0_9, %c0_10], %11 {strides = array<i32>} : memref<32x256xf32, #tpu.memory_space<vmem>>, vector<32x256xf32>,
    } else {
    }
    %c0 = arith.constant 0 : index
    %c0_1 = arith.constant 0 : index
    %3 = vector.load %arg6[%c0, %c0_1] : memref<32x256xf32, #tpu.memory_space<vmem>>, vector<32x256xf32>
    %c0_2 = arith.constant 0 : index
    %c0_3 = arith.constant 0 : index
    %c0_4 = arith.constant 0 : index
    %4 = vector.load %arg2[%c0_2, %c0_3, %c0_4] : memref<1x32x256xf32, #tpu.memory_space<vmem>>, vector<1x32x256xf32>
    %5 = vector.shape_cast %4 : vector<1x32x256xf32> to vector<32x256xf32>
    %6 = arith.maximumf %3, %5 : vector<32x256xf32>
    %c0_5 = arith.constant 0 : index
    %c0_6 = arith.constant 0 : index
    %7 = vector.load %arg6[%c0_5, %c0_6] : memref<32x256xf32, #tpu.memory_space<vmem>>, vector<32x256xf32>
    tpu.vector_store %arg6[%c0_5, %c0_6], %6 {strides = array<i32>} : memref<32x256xf32, #tpu.memory_space<vmem>>, vector<32x256xf32>,
    %c0_i32_7 = arith.constant 0 : i32
    %8 = arith.cmpi eq, %arg1, %c0_i32_7 : i32
    %9 = arith.extui %8 : i1 to i32
    %c0_i32_8 = arith.constant 0 : i32
    %10 = arith.cmpi ne, %9, %c0_i32_8 : i32
    scf.if %10 {
      %c0_9 = arith.constant 0 : index
      %c0_10 = arith.constant 0 : index
      %11 = vector.load %arg6[%c0_9, %c0_10] : memref<32x256xf32, #tpu.memory_space<vmem>>, vector<32x256xf32>
      %cst = arith.constant dense<0xFF800000> : vector<32xf32>
      %12 = vector.multi_reduction <maximumf>, %11, %cst [1] : vector<32x256xf32> to vector<32xf32>
      %13 = vector.shape_cast %12 : vector<32xf32> to vector<32x1xf32>
      %c0_11 = arith.constant 0 : index
      %c0_12 = arith.constant 0 : index
      %14 = vector.load %arg3[%c0_11, %c0_12] : memref<32x2xf32, #tpu.memory_space<vmem>>, vector<32x2xf32>
      %15 = vector.broadcast %13 : vector<32x1xf32> to vector<32x2xf32>
      %16 = arith.mulf %14, %15 : vector<32x2xf32>
      %cst_13 = arith.constant dense<0.000000e+00> : vector<2xf32>
      %17 = vector.multi_reduction <add>, %16, %cst_13 [0] : vector<32x2xf32> to vector<2xf32>
      %18 = vector.shape_cast %17 : vector<2xf32> to vector<1x2xf32>
      %cst_14 = arith.constant 0.000000e+00 : f32
      %19 = vector.broadcast %cst_14 : f32 to vector<1x2xf32>
      %20 = arith.maximumf %18, %19 : vector<1x2xf32>
      %c0_15 = arith.constant 0 : index
      %c0_16 = arith.constant 0 : index
      %21 = vector.load %arg4[%c0_15, %c0_16] : memref<32x2xf32, #tpu.memory_space<vmem>>, vector<32x2xf32>
      %22 = vector.broadcast %20 : vector<1x2xf32> to vector<32x2xf32>
      %23 = arith.mulf %21, %22 : vector<32x2xf32>
      %cst_17 = arith.constant dense<0.000000e+00> : vector<32xf32>
      %24 = vector.multi_reduction <add>, %23, %cst_17 [1] : vector<32x2xf32> to vector<32xf32>
      %25 = vector.shape_cast %24 : vector<32xf32> to vector<32x1xf32>
      %26 = arith.negf %25 : vector<32x1xf32>
      %27 = math.exp %26 : vector<32x1xf32>
      %cst_18 = arith.constant 1.000000e+00 : f32
      %28 = vector.broadcast %cst_18 : f32 to vector<32x1xf32>
      %29 = arith.addf %28, %27 : vector<32x1xf32>
      %30 = arith.divf %28, %29 : vector<32x1xf32>
      %c0_19 = arith.constant 0 : index
      %c0_20 = arith.constant 0 : index
      %c0_21 = arith.constant 0 : index
      %31 = vector.load %arg5[%c0_19, %c0_20, %c0_21] : memref<1x32x1xf32, #tpu.memory_space<vmem>>, vector<1x32x1xf32>
      %32 = vector.shape_cast %31 : vector<1x32x1xf32> to vector<32x1xf32>
      %33 = vector.shape_cast %30 : vector<32x1xf32> to vector<1x32x1xf32>
      tpu.vector_store %arg5[%c0_19, %c0_20, %c0_21], %33 {strides = array<i32>} : memref<1x32x1xf32, #tpu.memory_space<vmem>>, vector<1x32x1xf32>,
    } else {
    }
    return
  }
  func.func @transform_0(%arg0: i32, %arg1: i32) -> (i32, i32, i32) {
    %c0_i32 = arith.constant 0 : i32
    %c0_i32_0 = arith.constant 0 : i32
    return %arg0, %c0_i32, %arg1 : i32, i32, i32
  }
  func.func @transform_1(%arg0: i32, %arg1: i32) -> (i32, i32) {
    %c0_i32 = arith.constant 0 : i32
    %c0_i32_0 = arith.constant 0 : i32
    %c0_i32_1 = arith.constant 0 : i32
    return %c0_i32, %c0_i32_0 : i32, i32
  }
  func.func @transform_2(%arg0: i32, %arg1: i32) -> (i32, i32) {
    %c0_i32 = arith.constant 0 : i32
    %c0_i32_0 = arith.constant 0 : i32
    %c0_i32_1 = arith.constant 0 : i32
    return %c0_i32, %c0_i32_0 : i32, i32
  }
  func.func @transform_3(%arg0: i32, %arg1: i32) -> (i32, i32, i32) {
    %c0_i32 = arith.constant 0 : i32
    %c0_i32_0 = arith.constant 0 : i32
    %c0_i32_1 = arith.constant 0 : i32
    return %arg0, %c0_i32, %c0_i32_0 : i32, i32, i32
  }
}

</mosaic_0001>

<bundles_post_ra>
// kernel: tpu_custom_call.1
= control target key start
LH: loop header
LB: loop body
LE: loop exit
PB: predicated region body
PF: predicated region fallthrough
CT: control target
= control target key end

     0   :  { %8 = vsyncpa [#allocation4], 0  ;;  %s778_s0 = inlined_call_operand.hbm [shape: f32[2,32,256], index: 0, kind: input, shape index: {}]   ;;  %s779_s1 = inlined_call_operand.vmem [shape: f32[32,2], index: 1, kind: input, shape index: {}]   ;;  %s780_s2 = inlined_call_operand.vmem [shape: f32[32,2], index: 2, kind: input, shape index: {}]   ;;  %s781_s3 = inlined_call_operand.vmem [shape: f32[2,32,1], index: 3, kind: output, shape index: {}]  }
   0x1   :  { %10 = vsyncpa [#allocation4 + $0x1], 0  ;;  %s622_s12 = smov 0   ;;  %s624_s13 = smov 0  }
   0x2   :  { %s626_s14 = smov 0   ;;  %s628_s15 = smov 0  }
   0x3   :  { %s630_s16 = smov 0   ;;  %s632_s17 = smov 0  }
   0x4 LB: > { %s425_s18 = sadd.s32 4294967295, %s597_s17   ;;  %s28_s19 = sadd.s32 1, %s593_s16  ;;  %s597_s17 = sphi %s632_s17, %s16_s17   ;;  %s593_s16 = sphi %s630_s16, %s789_s16   ;;  %s589_s15 = sphi %s628_s15, %s788_s15   ;;  %s585_s14 = sphi %s626_s14, %s787_s14   ;;  %s581_s13 = sphi %s624_s13, %s786_s13   ;;  %s577_s12 = sphi %s622_s12, %s785_s12  }
   0x5   : > { %p30_p0 = scmp.ge.s32.totalorder %s28_s19, 2  ;;  %s37_s20 = sadd.s32 1, %s585_s14 }
   0x6   : > { %p44_p1 = scmp.ne.s32.totalorder %s585_s14, %s581_s13  ;;  %p45_p2 = scmp.eq.s32.totalorder %s597_s17, 0 }
   0x7   : > { %s791_s19 = smov (%p30_p0, %s28_s19), 0  ;;  %p50_p4 = scmp.ne.s32.totalorder %s581_s13, %s577_s12 }
   0x8   : > { %p658_p3 = por %p45_p2, %p44_p1  ;;  %s32_s22 = ssub.s32 %s593_s16, %s791_s19 }
   0x9   : > { %p51_p5 = scmp.eq.s32.totalorder %s425_s18, 0  ;;  %p35_p6 = scmp.eq.s32.totalorder %s32_s22, 0 }
   0xa   : > { %p450_p8 = scmp.lt.s32.totalorder %s597_s17, 2  ;;  %s148_s25 = sand.u32 1, %s585_s14  }
   0xb   : > { %p665_p7 = por %p51_p5, %p50_p4  ;;  %s442_s26 = sshll.u32 %s593_s16, 10 }
   0xc   : > { %s671_s24 = scalar_select %p35_p6, %s585_s14, %s37_s20  }
   0xd   : > { %s429_s27 = sshll.u32 %s148_s25, 6  ;;  %s678_s30 = scalar_lea.hbm %s778_s0, %s442_s26 }
   0xe   : > { %s152_s4 = scalar_lea.vmem [#allocation3], %s429_s27  ;;  %p682_p9 = pnand %p450_p8, %p658_p3 }
   0xf   : > { %s161_s5 = sshll.u32 %s152_s4, 4  ;;  %s688_s7 = scalar_lea.sflag [#allocation4], %s148_s25  ;;  %s686_s5 = int_to_ptr.vmem [resolvable:$true] %s161_s5 }
  0x10   : > { %s517_s8 = scalar_lea.hbm %s678_s30, 1024  ;;  %p519_p11 = pneg %p682_p9 }
  0x11   : > { %p518_p10 = scmp.ne.s32.totalorder %s678_s30, %s517_s8  ;;  %s522_s11 = scalar_lea.hbm %s778_s0, 2048 }
  0x12   : > { %p523_p0 = scmp.lt.u32.totalorder %s678_s30, %s778_s0  ;;  %p524_p1 = scmp.lt.u32.totalorder %s522_s11, %s517_s8 }
  0x13   : > { %p520_p12 = pnand %p519_p11, %p518_p10  ;;  %p526_p3 = scmp.lt.u32.totalorder %s517_s8, %s678_s30 }
  0x14   : > { %p525_p2 = por %p524_p1, %p523_p0 }
  0x15   : > { %p521_p13 = pneg %p520_p12 }
  0x16   : > { %p527_p4 = por %p526_p3, %p525_p2 }
  0x18   : > { %p528_p5 = pnand %p527_p4, %p521_p13 }
  0x1a   : > { %531 = shalt.err (!%p528_p5)
}
  0x1b   : > { %s532_s20 = scalar_lea.vmem %s686_s5, 1024  ;;  %s599_s21 = smov [#allocation3]  }
  0x1c   : > { %p533_p6 = scmp.ne.s32.totalorder %s686_s5, %s532_s20  ;;  %s537_s22 = sshll.u32 %s599_s21, 4  ;;  %s538_s22 = int_to_ptr.vmem [resolvable:$false] %s537_s22 }
  0x1d   : > { %s539_s25 = scalar_lea.vmem %s538_s22, 2048  ;;  %p540_p12 = scmp.lt.s32.totalorder %s686_s5, %s538_s22 }
  0x1e   : > { %p535_p8 = pnand %p533_p6, %p519_p11  ;;  %p541_p0 = scmp.lt.s32.totalorder %s539_s25, %s532_s20 }
  0x20   : > { %p536_p10 = pneg %p535_p8  ;;  %p542_p1 = por %p541_p0, %p540_p12 }
  0x22   : > { %p543_p2 = pnand %p542_p1, %p536_p10 }
  0x24   : > { %546 = shalt.err (!%p543_p2)
}
  0x25   : > { %s600_s26 = smov 256   ;;  %s601_s27 = smov 16  }
  0x26   : > { %449 = dma.hbm_to_vmem [thread:$0]  (!%p682_p9), %s678_s30, 1024, %s686_s5, %s688_s7, %s600_s26, %s600_s26, %s601_s27  }
  0x27   : > { %p432_p11 = scmp.ge.s32.totalorder %s597_s17, 1  ;;  %p169_p13 = scmp.lt.s32.totalorder %s597_s17, 3 }
  0x29   : > { %p170_p3 = pnand %p432_p11, %p169_p13 }
  0x2a   : > { %s175_s28 = sand.u32 (!%p170_p3), 1, %s581_s13  }
  0x2b   : > { %173 = sbr.rel (%p170_p3) target bundleno = 400 (0x190), region = 32  ;;  %s433_s29 = sshll.u32 (!%p170_p3), %s175_s28, 6 }
  0x2c   : > { %s176_s4 = scalar_lea.sflag (!%p170_p3), [#allocation4], %s175_s28  ;;  %s179_s8 = scalar_lea.vmem (!%p170_p3), [#allocation3], %s433_s29 }
  0x32   : > { %572 = dma.done.wait (%p665_p7), %s176_s4, 1024  }
  0x33   : > { %574 = vsyncadd (%p665_p7), %s176_s4, 4294966272  ;;  %v228_v0 = vld [vmem:[%s179_s8] sm:$0xff]  ;;  %v229_v1 = vld [vmem:[%s179_s8 + $0x8] sm:$0xff]  ;;  %vm283_vm0 = vcmask 15360   ;;  %p203_p7 = scmp.lt.s32.totalorder %s589_s15, 1  ;;  %vm342_vm1 = vcmask 7168  }
  0x34   : > { %v232_v2 = vld [vmem:[%s179_s8 + $0x20] sm:$0xff]  ;;  %v263_v3 = vmax.f32 %v228_v0, %v229_v1  ;;  %v233_v4 = vld [vmem:[%s179_s8 + $0x28] sm:$0xff]  ;;  %v230_v5 = vld [vmem:[%s179_s8 + $0x10] sm:$0xff] }
  0x35   : > { %v231_v6 = vld [vmem:[%s179_s8 + $0x18] sm:$0xff]  ;;  %v269_v7 = vmax.f32 %v232_v2, %v233_v4  ;;  %v234_v8 = vld [vmem:[%s179_s8 + $0x30] sm:$0xff]  ;;  %v275_v12 = vld [vmem:[%s779_s1] sm:$0xff]  ;;  %s793_s15 = smov (!%p203_p7, %s589_s15), 1 }
  0x36   : > { %v235_v9 = vld [vmem:[%s179_s8 + $0x38] sm:$0xff]  ;;  %264 = vmax.xlane.f32.xlu0 %v263_v3  ;;  %v266_v10 = vmax.f32 %v230_v5, %v231_v6  ;;  %v277_v15 = vld [vmem:[%s779_s1 + $0x10] sm:$0xff]  ;;  %v276_v16 = vld [vmem:[%s779_s1 + $0x8] sm:$0xff]  ;;  %s443_s28 = sshll.u32 %s793_s15, 5 }
  0x37   : > { %270 = vmax.xlane.f32.xlu1 %v269_v7  ;;  %v272_v11 = vmax.f32 %v234_v8, %v235_v9  ;;  %v278_v18 = vld [vmem:[%s779_s1 + $0x18] sm:$0xff]  ;;  %v299_v37 = vld [vmem:[%s780_s2 + $0x8] sm:$0xff]  ;;  %v298_v38 = vld [vmem:[%s780_s2] sm:$0xff]  ;;  %s207_s8 = scalar_lea.vmem %s781_s3, %s443_s28 }
  0x38   : > { %v301_v40 = vld [vmem:[%s780_s2 + $0x18] sm:$0xff]  ;;  %v300_v41 = vld [vmem:[%s780_s2 + $0x10] sm:$0xff] }
  0x3a   : > { %267 = vmax.xlane.f32.xlu0 %v266_v10 }
  0x3b   : > { %273 = vmax.xlane.f32.xlu1 %v272_v11 }
  0xc3   : > { %v265_v13 = vpop.xlane.xlu0 %264 }
  0xc4   : > { %v271_v14 = vpop.xlane.xlu1 %270  ;;  %v279_v17 = vmul.f32 %v275_v12, %v265_v13 }
  0xc5   : > { %v281_v20 = vmul.f32 %v277_v15, %v271_v14 }
  0xc6   : > { %v284_v24 = vsel %vm283_vm0, %v279_v17, 0.0 }
  0xc7   : > { %v268_v19 = vpop.xlane.xlu0 %267  ;;  %v287_v27 = vsel %vm283_vm0, %v281_v20, 0.0 }
  0xc8   : > { %v280_v21 = vmul.f32 %v276_v16, %v268_v19  ;;  %v274_v22 = vpop.xlane.xlu1 %273 }
  0xc9   : > { %v282_v23 = vmul.f32 %v278_v18, %v274_v22 }
  0xca   : > { %v285_v25 = vsel %vm283_vm0, %v280_v21, 0.0 }
  0xcb   : > { %v286_v26 = vadd.f32 %v285_v25, %v284_v24  ;;  %v289_v28 = vsel %vm283_vm0, %v282_v23, 0.0 }
  0xcd   : > { %v288_v29 = vadd.f32 %v287_v27, %v286_v26 }
  0xcf   : > { %v290_v30 = vadd.f32 %v289_v28, %v288_v29 }
  0xd1   : > { %v291_v31 = vrot.slane %v290_v30, 4 }
  0xd3   : > { %v292_v32 = vadd.f32 %v291_v31, %v290_v30 }
  0xd5   : > { %v293_v33 = vrot.slane %v292_v32, 2 }
  0xd7   : > { %v294_v34 = vadd.f32 %v293_v33, %v292_v32 }
  0xd9   : > { %v295_v35 = vrot.slane %v294_v34, 1 }
  0xdb   : > { %v296_v36 = vadd.f32 %v295_v35, %v294_v34 }
  0xdd   : > { %v297_v39 = vmax.f32 %v296_v36, 0.0 }
  0xdf   : > { %v303_v42 = vmul.f32 %v299_v37, %v297_v39  ;;  %v302_v43 = vmul.f32 %v298_v38, %v297_v39  ;;  %v305_v46 = vmul.f32 %v301_v40, %v297_v39  ;;  %v304_v47 = vmul.f32 %v300_v41, %v297_v39 }
  0xe1   : > { %v309_v44 = vsel %vm283_vm0, %v303_v42, 0.0  ;;  %v306_v45 = vsel %vm283_vm0, %v302_v43, 0.0  ;;  %v315_v48 = vsel %vm283_vm0, %v305_v46, 0.0  ;;  %v312_v49 = vsel %vm283_vm0, %v304_v47, 0.0 }
  0xe2   : > { %310 = vadd.xlane.f32.xlu1 %v309_v44  ;;  %307 = vadd.xlane.f32.xlu0 %v306_v45 }
  0xe6   : > { %316 = vadd.xlane.f32.xlu1 %v315_v48  ;;  %313 = vadd.xlane.f32.xlu0 %v312_v49 }
 0x16f   : > { %v311_v50 = vpop.xlane.xlu1 %310  ;;  %v308_v51 = vpop.xlane.xlu0 %307 }
 0x170   : > { %v437_v52 = vmul.f32 -1.442695, %v311_v50  ;;  %v436_v53 = vmul.f32 -1.442695, %v308_v51 }
 0x172   : > { %501 = vpow2.f32 %v437_v52 }
 0x173   : > { %503 = vpow2.f32 %v436_v53  ;;  %v317_v54 = vpop.xlane.xlu1 %316  ;;  %v314_v55 = vpop.xlane.xlu0 %313 }
 0x174   : > { %v439_v56 = vmul.f32 -1.442695, %v317_v54  ;;  %v438_v57 = vmul.f32 -1.442695, %v314_v55 }
 0x176   : > { %505 = vpow2.f32 %v439_v56 }
 0x177   : > { %507 = vpow2.f32 %v438_v57 }
 0x17c   : > { %v502_v58 = vpop.eup %501 }
 0x17d   : > { %v504_v59 = vpop.eup %503  ;;  %v331_v60 = vadd.f32 1.0, %v502_v58 }
 0x17e   : > { %v330_v61 = vadd.f32 1.0, %v504_v59 }
 0x17f   : > { %509 = vrcp.f32 %v331_v60 }
 0x180   : > { %v506_v62 = vpop.eup %505  ;;  %511 = vrcp.f32 %v330_v61 }
 0x181   : > { %v508_v63 = vpop.eup %507  ;;  %v333_v0 = vadd.f32 1.0, %v506_v62 }
 0x182   : > { %v332_v1 = vadd.f32 1.0, %v508_v63 }
 0x183   : > { %513 = vrcp.f32 %v333_v0 }
 0x184   : > { %515 = vrcp.f32 %v332_v1 }
 0x189   : > { %v510_v2 = vpop.eup %509 }
 0x18a   : > { %v512_v3 = vpop.eup %511  ;;  %344 = vst.msk [vmem:[%s207_s8 + $0x8] sm:$0xff] %vm342_vm1, %v510_v2 }
 0x18b   : > { %343 = vst.msk [vmem:[%s207_s8] sm:$0xff] %vm342_vm1, %v512_v3 }
 0x18d   : > { %v514_v4 = vpop.eup %513 }
 0x18e   : > { %v516_v5 = vpop.eup %515  ;;  %346 = vst.msk [vmem:[%s207_s8 + $0x18] sm:$0xff] %vm342_vm1, %v514_v4 }
 0x18f   : > { %345 = vst.msk [vmem:[%s207_s8 + $0x10] sm:$0xff] %vm342_vm1, %v516_v5 }
 0x190 PF: > { %s16_s17 = sadd.s32 1, %s597_s17   ;;  %s785_s12 = smov %s581_s13 }
 0x191   : > { %p13_p9 = scmp.ge.s32.totalorder %s16_s17, 4   ;;  %s786_s13 = smov %s585_s14 }
 0x192   : > { %s787_s14 = smov %s671_s24  ;;  %s788_s15 = smov %s593_s16 }
 0x193   : > { %s789_s16 = smov %s791_s19  ;;  %15 = sbr.rel (!%p13_p9) target bundleno = 4 (0x4), region = 80 }
 0x19a   :  { %368 = vsyncpa [#allocation4], 1 }
 0x19b   :  { %370 = vsyncpa [#allocation4 + $0x1], 1 }

</bundles_post_ra>
